<compile_context>
chip_gen: v7x
topology: tpu7x:2x2x1
jax: 0.10.0
libtpu: 0.0.40
codegen_flags: <defaults>
</compile_context>

<pallas_src>
import jax
import jax.numpy as jnp
from jax.experimental import pallas as pl
from jax.experimental.pallas import tpu as pltpu

_LANE = 128
_VMEM_LIMIT_BYTES = 32 * 1024 * 1024    # safe explicit scoped-VMEM limit on v5e/v6e/v7x
_TILED_VMEM_BUDGET = 24 * 1024 * 1024   # target per-step double-buffered working set
_WHOLE_ARRAY_BYTES = 2 * 1024 * 1024    # below this a single no-grid invocation wins


def _cdiv(a, b):
    return -(-a // b)


def _round_up(v, m):
    return _cdiv(v, m) * m


def _split_dim(dim, max_tile, align, min_tile=None):
    """Pick (padded_dim, tile): tile is a multiple of `align`, <= max_tile,
    tile * nblocks == padded_dim >= dim with minimal padding, preferring
    MXU-friendly tiles (>= min_tile) over exactly-dividing small tiles."""
    if min_tile is None:
        min_tile = align
    dim_a = _round_up(dim, align)
    if dim_a <= max_tile:
        return dim_a, dim_a
    n0 = _cdiv(dim_a, max_tile)
    best_key, best = None, None
    for nblk in range(n0, min(n0 + 32, _cdiv(dim_a, align)) + 1):
        tile = _round_up(_cdiv(dim_a, nblk), align)
        if tile > max_tile:
            continue
        padded = tile * nblk
        small = tile < min(min_tile, dim_a)
        key = (small, padded, nblk)
        if best_key is None or key < best_key:
            best_key, best = key, (padded, tile)
        if padded == dim_a and not small:
            break
    return best


# ----------------------------------------------------------------------------
# Kernels
# ----------------------------------------------------------------------------
def _linear_onepass_kernel(x_ref, w_ref, b_ref, o_ref):
    # Single dot over the full contraction depth; f32 epilogue bias add.
    acc = jnp.dot(x_ref[...], w_ref[...], preferred_element_type=jnp.float32)
    o_ref[...] = (acc + b_ref[...]).astype(o_ref.dtype)


def _linear_kacc_out_kernel(x_ref, w_ref, b_ref, o_ref):
    # f32 output: accumulate directly into the k-resident output block.
    @pl.when(pl.program_id(2) == 0)
    def _():
        o_ref[...] = jnp.broadcast_to(b_ref[...], o_ref.shape)

    o_ref[...] += jnp.dot(x_ref[...], w_ref[...], preferred_element_type=jnp.float32)


def _linear_kacc_scratch_kernel(x_ref, w_ref, b_ref, o_ref, acc_ref):
    # Non-f32 output: f32 VMEM accumulator, bias + cast in the K-finalize step.
    k = pl.program_id(2)

    @pl.when(k == 0)
    def _():
        acc_ref[...] = jnp.zeros_like(acc_ref)

    acc_ref[...] += jnp.dot(x_ref[...], w_ref[...], preferred_element_type=jnp.float32)

    @pl.when(k == pl.num_programs(2) - 1)
    def _():
        o_ref[...] = (acc_ref[...] + b_ref[...]).astype(o_ref.dtype)


# ----------------------------------------------------------------------------
# pallas_call wrappers
# ----------------------------------------------------------------------------
def _whole_call(x, w, b, out_dtype, cost):
    m, n = x.shape[0], w.shape[1]
    return pl.pallas_call(
        _linear_onepass_kernel,
        out_shape=jax.ShapeDtypeStruct((m, n), out_dtype),
        in_specs=[
            pl.BlockSpec(memory_space=pltpu.MemorySpace.VMEM),
            pl.BlockSpec(memory_space=pltpu.MemorySpace.VMEM),
            pl.BlockSpec(memory_space=pltpu.MemorySpace.VMEM),
        ],
        out_specs=pl.BlockSpec(memory_space=pltpu.MemorySpace.VMEM),
        compiler_params=pltpu.CompilerParams(vmem_limit_bytes=_VMEM_LIMIT_BYTES),
        cost_estimate=cost,
    )(x, w, b)


def _grid2d_call(x, w, b, out_dtype, tm, tn, cost):
    m, kdim = x.shape
    n = w.shape[1]
    return pl.pallas_call(
        _linear_onepass_kernel,
        out_shape=jax.ShapeDtypeStruct((m, n), out_dtype),
        grid_spec=pltpu.PrefetchScalarGridSpec(
            num_scalar_prefetch=0,
            grid=(m // tm, n // tn),
            in_specs=[
                pl.BlockSpec((tm, kdim), lambda i, j: (i, 0)),
                pl.BlockSpec((kdim, tn), lambda i, j: (0, j)),
                pl.BlockSpec((1, tn), lambda i, j: (0, j)),
            ],
            out_specs=pl.BlockSpec((tm, tn), lambda i, j: (i, j)),
        ),
        compiler_params=pltpu.CompilerParams(
            dimension_semantics=("parallel", "parallel"),
            vmem_limit_bytes=_VMEM_LIMIT_BYTES,
        ),
        cost_estimate=cost,
    )(x, w, b)


def _grid3d_call(x, w, b, out_dtype, tm, tn, tk, cost):
    m, kdim = x.shape
    n = w.shape[1]
    f32_out = jnp.dtype(out_dtype) == jnp.dtype(jnp.float32)
    kernel = _linear_kacc_out_kernel if f32_out else _linear_kacc_scratch_kernel
    scratch = [] if f32_out else [pltpu.VMEM((tm, tn), jnp.float32)]
    return pl.pallas_call(
        kernel,
        out_shape=jax.ShapeDtypeStruct((m, n), out_dtype),
        grid_spec=pltpu.PrefetchScalarGridSpec(
            num_scalar_prefetch=0,
            grid=(m // tm, n // tn, kdim // tk),
            in_specs=[
                pl.BlockSpec((tm, tk), lambda i, j, k: (i, k)),
                pl.BlockSpec((tk, tn), lambda i, j, k: (k, j)),
                pl.BlockSpec((1, tn), lambda i, j, k: (0, j)),
            ],
            out_specs=pl.BlockSpec((tm, tn), lambda i, j, k: (i, j)),
            scratch_shapes=scratch,
        ),
        compiler_params=pltpu.CompilerParams(
            dimension_semantics=("parallel", "parallel", "arbitrary"),
            vmem_limit_bytes=_VMEM_LIMIT_BYTES,
        ),
        cost_estimate=cost,
    )(x, w, b)


# ----------------------------------------------------------------------------
# The concrete Pallas-backed `core`:  y = x @ W + b.
# ----------------------------------------------------------------------------
class PallasLinear:
    """Linear layer whose matmul runs in Pallas TPU kernels.

    W and b are zero-padded once at construction so K and N are lane-dense
    multiples of 128; x is padded/cast per call only when needed and results
    are sliced back to the caller's logical shape (all under jax.jit)."""

    def __init__(self, w, b, *, compute_dtype=None,
                 tile_m=512, tile_n=512, tile_k=None):
        w = jnp.asarray(w)
        h, n = w.shape
        self._h, self._n = h, n
        self._compute_dtype = compute_dtype
        bf16 = compute_dtype == jnp.bfloat16
        self._m_align = 16 if bf16 else 8
        if tile_k is None:
            tile_k = 2048 if bf16 else 1024
        self._tile_m = tile_m

        self._np, self._tn = _split_dim(n, tile_n, _LANE, min_tile=256)
        self._kp, self._tk = _split_dim(h, tile_k, _LANE, min_tile=256)

        pad_k, pad_n = self._kp - h, self._np - n
        if pad_k or pad_n:
            w = jnp.pad(w, ((0, pad_k), (0, pad_n)))
        if compute_dtype is not None:
            w = w.astype(compute_dtype)
        self._w = w
        self._w_bytes = self._w.dtype.itemsize

        # Bias stays f32 so the epilogue add runs in f32.
        b = jnp.asarray(b, dtype=jnp.float32).reshape(1, -1)
        if pad_n:
            b = jnp.pad(b, ((0, 0), (0, pad_n)))
        self._b = b

        self._jit_forward = jax.jit(self._forward)

    def __call__(self, x):
        return self._jit_forward(x, self._w, self._b)

    def _forward(self, x, w, b):
        s, h = x.shape
        assert h == self._h, f"expected hidden={self._h}, got {h}"
        out_dtype = x.dtype

        kp, np_ = self._kp, self._np
        tn, tk = self._tn, self._tk
        cdt = self._compute_dtype if self._compute_dtype is not None else x.dtype
        xb = jnp.dtype(cdt).itemsize
        wb = self._w_bytes
        ob = jnp.dtype(out_dtype).itemsize

        mp, tm = _split_dim(s, self._tile_m, self._m_align)

        total = mp * kp * xb + kp * np_ * wb + np_ * 4 + mp * np_ * ob
        whole = total <= _WHOLE_ARRAY_BYTES

        kblocks = 1
        if not whole:
            # v7x dual-TC: make sure at least 2 blocks exist on a parallel axis.
            if (mp // tm == 1) and (np_ // tn == 1):
                if mp >= 256:
                    tm = _round_up(_cdiv(mp, 2), self._m_align)
                    mp = 2 * tm
                elif tn >= 512 and tn % 256 == 0:
                    tn //= 2
            # Collapse the K axis whenever the full-depth working set fits VMEM.
            fp = 2 * (tm * kp * xb + kp * tn * wb + tn * 4 + tm * tn * ob)
            kblocks = 1 if fp <= _TILED_VMEM_BUDGET else kp // tk

        # Pad / cast x only when needed; fused under jit with the kernel call.
        xp = x
        if self._compute_dtype is not None and x.dtype != self._compute_dtype:
            xp = xp.astype(self._compute_dtype)
        if mp != s or kp != h:
            xp = jnp.pad(xp, ((0, mp - s), (0, kp - h)))

        cost = pl.CostEstimate(
            flops=2 * mp * np_ * kp,
            transcendentals=0,
            bytes_accessed=mp * kp * xb + kp * np_ * wb + np_ * 4 + mp * np_ * ob,
        )

        if whole:
            out = _whole_call(xp, w, b, out_dtype, cost)
        elif kblocks == 1:
            out = _grid2d_call(xp, w, b, out_dtype, tm, tn, cost)
        else:
            out = _grid3d_call(xp, w, b, out_dtype, tm, tn, tk, cost)

        if mp != s or np_ != self._n:
            out = out[:s, :self._n]
        return out


# ----------------------------------------------------------------------------
# The Module wrapper (exact semantics of the PyTorch class).
# ----------------------------------------------------------------------------
class Module:
    def __init__(self):
        self.core = None

    def set_core(self, core):
        self.core = core

    def __call__(self, x):
        # forward(x) = self.core(x)
        return self.core(x)


if __name__ == "__main__":
    key = jax.random.PRNGKey(0)
    keys = jax.random.split(key, 16)

    def make(i, s, h, n, x_dtype=jnp.float32):
        x = jax.random.normal(keys[i], (s, h), dtype=jnp.float32).astype(x_dtype)
        w = jax.random.normal(keys[i + 1], (h, n), dtype=jnp.float32) * 0.02
        b = jax.random.normal(keys[i + 2], (1, n), dtype=jnp.float32) * 0.01
        return x, w, b

    # ---- Case 1: tiny (seq=8, hidden=32) -> whole-array VMEM kernel ----
    x, w, b = make(0, 8, 32, 32)
    module = Module()
    # TODO(synk): `core` is user-supplied at runtime in the original module;
    # a concrete Pallas-backed fused linear layer is installed here.
    module.set_core(PallasLinear(w, b))
    out = module(x)
    jax.block_until_ready(out)
    ref = x @ w + b
    assert out.shape == (8, 32)
    assert jnp.allclose(out, ref, atol=1e-5, rtol=1e-5), "case 1 mismatch"

    # ---- Case 2: medium, bf16 MXU compute -> still a single whole-array call ----
    x, w, b = make(3, 256, 512, 384)
    m2 = Module()
    m2.set_core(PallasLinear(w, b, compute_dtype=jnp.bfloat16))
    out = m2(x)
    jax.block_until_ready(out)
    ref = x @ w + b
    assert out.shape == (256, 384)
    assert jnp.allclose(out, ref, atol=5e-2, rtol=5e-2), "case 2 mismatch"

    # ---- Case 3: f32, collapsed-K 2-D (parallel x parallel) grid ----
    x, w, b = make(6, 640, 1536, 1024)
    m3 = Module()
    m3.set_core(PallasLinear(w, b))
    out = m3(x)
    jax.block_until_ready(out)
    ref = x @ w + b
    assert out.shape == (640, 1024)
    assert jnp.allclose(out, ref, atol=2e-2, rtol=2e-2), "case 3 mismatch"

    # ---- Case 4: f32, deep K -> 3-D grid accumulating into the output block ----
    x, w, b = make(9, 384, 8192, 512)
    m4 = Module()
    m4.set_core(PallasLinear(w, b))
    out = m4(x)
    jax.block_until_ready(out)
    ref = x @ w + b
    assert out.shape == (384, 512)
    assert jnp.allclose(out, ref, atol=2e-2, rtol=2e-2), "case 4 mismatch"

    # ---- Case 5: bf16 in/out, deep K -> 3-D grid with f32 scratch accumulator ----
    x, w, b = make(12, 256, 10240, 512, x_dtype=jnp.bfloat16)
    m5 = Module()
    m5.set_core(PallasLinear(w, b, compute_dtype=jnp.bfloat16))
    out = m5(x)
    jax.block_until_ready(out)
    ref = x.astype(jnp.float32) @ w + b
    assert out.shape == (256, 512)
    assert out.dtype == jnp.bfloat16
    assert jnp.allclose(out.astype(jnp.float32), ref, atol=1e-1, rtol=5e-2), "case 5 mismatch"

    print("KERNEL_OK")
</pallas_src>

<mosaic_0001>
module attributes {stable_mosaic.version = 11 : i64} {
  func.func @_linear_onepass_kernel(%arg0: memref<8x128xf32, #tpu.memory_space<vmem>>, %arg1: memref<128x128xf32, #tpu.memory_space<vmem>>, %arg2: memref<1x128xf32, #tpu.memory_space<vmem>>, %arg3: memref<8x128xf32, #tpu.memory_space<vmem>>) attributes {dimension_semantics = [], scalar_prefetch = 0 : i64, scratch_operands = 0 : i64, tpu.core_type = #tpu.core_type<tc>} {
    %c0 = arith.constant 0 : index
    %c0_0 = arith.constant 0 : index
    %0 = vector.load %arg0[%c0, %c0_0] : memref<8x128xf32, #tpu.memory_space<vmem>>, vector<8x128xf32>
    %c0_1 = arith.constant 0 : index
    %c0_2 = arith.constant 0 : index
    %1 = vector.load %arg1[%c0_1, %c0_2] : memref<128x128xf32, #tpu.memory_space<vmem>>, vector<128x128xf32>
    %cst = arith.constant dense<0.000000e+00> : vector<8x128xf32>
    %2 = tpu.matmul %0, %1, %cst {dimension_numbers = #tpu.dot_dimension_numbers<[1], [0], [0], [1], [0, 0, 1, 1], [], []>} : vector<8x128xf32>, vector<128x128xf32>, vector<8x128xf32> -> vector<8x128xf32>
    %c0_3 = arith.constant 0 : index
    %c0_4 = arith.constant 0 : index
    %3 = vector.load %arg2[%c0_3, %c0_4] : memref<1x128xf32, #tpu.memory_space<vmem>>, vector<1x128xf32>
    %4 = vector.broadcast %3 : vector<1x128xf32> to vector<8x128xf32>
    %5 = arith.addf %2, %4 : vector<8x128xf32>
    %c0_5 = arith.constant 0 : index
    %c0_6 = arith.constant 0 : index
    %6 = vector.load %arg3[%c0_5, %c0_6] : memref<8x128xf32, #tpu.memory_space<vmem>>, vector<8x128xf32>
    tpu.vector_store %arg3[%c0_5, %c0_6], %5 {strides = array<i32>} : memref<8x128xf32, #tpu.memory_space<vmem>>, vector<8x128xf32>,
    return
  }
}

</mosaic_0001>

<bundles_post_ra>
// kernel: _forward.1
= control target key start
LH: loop header
LB: loop body
LE: loop exit
PB: predicated region body
PF: predicated region fallthrough
CT: control target
= control target key end

     0   :  { %8 = vsyncpa [#allocation3], 0  ;;  %s328_s0 = inlined_call_operand.vmem [shape: f32[8,128], index: 0, kind: input, shape index: {}]   ;;  %s329_s1 = inlined_call_operand.hbm [shape: f32[128,128], index: 1, kind: input, shape index: {}]   ;;  %s330_s2 = inlined_call_operand.vmem [shape: f32[1,128], index: 2, kind: input, shape index: {}]   ;;  %s331_s3 = inlined_call_operand.hbm [shape: f32[8,128], index: 3, kind: output, shape index: {}]  }
   0x1   :  { %9 = vsyncpa [#allocation4], 0  ;;  %s271_s12 = smov [#allocation2]   ;;  %s223_s16 = scalar_lea.hbm %s329_s1, 2048 }
   0x2   :  { %s17_s13 = sshll.u32 %s271_s12, 4  ;;  %p224_p0 = scmp.ne.s32.totalorder %s329_s1, %s223_s16  ;;  %s18_s13 = int_to_ptr.vmem [resolvable:$true] %s17_s13 }
   0x3   :  { %p227_p1 = scmp.lt.u32.totalorder %s223_s16, %s329_s1 }
   0x5   :  { %p229_p2 = pnand %p227_p1, %p224_p0 }
   0x7   :  { %232 = shalt.err (!%p229_p2)
}
   0x8   :  { %s233_s21 = scalar_lea.vmem %s18_s13, 2048  ;;  %p238_p4 = scmp.lt.s32.totalorder %s18_s13, %s18_s13 }
   0x9   :  { %p234_p3 = scmp.ne.s32.totalorder %s18_s13, %s233_s21  ;;  %p239_p5 = scmp.lt.s32.totalorder %s233_s21, %s233_s21 }
   0xb   :  { %p240_p6 = por %p239_p5, %p238_p4 }
   0xd   :  { %p241_p7 = pnand %p240_p6, %p234_p3 }
   0xf   :  { %244 = shalt.err (!%p241_p7)
}
  0x10   :  { %s272_s22 = smov 128   ;;  %s273_s23 = smov 8  }
  0x11   :  { %23 = dma.hbm_to_vmem [thread:$0]  %s329_s1, 2048, %s18_s13, [#allocation3], %s272_s22, %s272_s22, %s273_s23  }
  0x12   :  { %267 = dma.done.wait [#allocation3], 2048  }
  0x13   :  { %268 = vsyncadd [#allocation3], 4294965248  ;;  %v274_v0 = vmov 0.0|0.0   ;;  %vm275_vm0 = vmmov 0   ;;  %v276_v1 = vmov 0.0   ;;  %v30_v2 = vld [vmem:[#allocation2] sm:$0xff] }
  0x14   :  { %192 = vmatprep.subr.bf16.mxu0 %v274_v0  ;;  %189 = vmatprep.mubr.msk.f32.mxu0 %vm275_vm0, %v276_v1  ;;  %v31_v3 = vld [vmem:[#allocation2 + $0x8] sm:$0xff]  ;;  %v32_v4 = vld [vmem:[#allocation2 + $0x10] sm:$0xff]  ;;  %v33_v6 = vld [vmem:[#allocation2 + $0x18] sm:$0xff]  ;;  %s277_s29 = smov [#allocation5]  }
  0x15   :  { %v193_v5 = vpack.c.bf16 %v31_v3, %v30_v2  ;;  %v196_v7 = vpack.c.bf16 %v33_v6, %v32_v4  ;;  %v34_v8 = vld [vmem:[#allocation2 + $0x20] sm:$0xff]  ;;  %v35_v9 = vld [vmem:[#allocation2 + $0x28] sm:$0xff]  ;;  %v36_v11 = vld [vmem:[#allocation2 + $0x30] sm:$0xff]  ;;  %s130_s30 = sshll.u32 %s277_s29, 4  ;;  %s131_s30 = int_to_ptr.vmem [resolvable:$true] %s130_s30 }
  0x16   :  { %v199_v10 = vpack.c.bf16 %v35_v9, %v34_v8  ;;  %v37_v12 = vld [vmem:[#allocation2 + $0x38] sm:$0xff]  ;;  %v38_v14 = vld [vmem:[#allocation2 + $0x40] sm:$0xff]  ;;  %v39_v15 = vld [vmem:[#allocation2 + $0x48] sm:$0xff]  ;;  %s245_s4 = scalar_lea.vmem %s131_s30, 128  ;;  %p250_p9 = scmp.lt.s32.totalorder %s131_s30, %s131_s30 }
  0x17   :  { %194 = vmatpush3.bf16.msra.mxu0 %v193_v5  ;;  %v202_v13 = vpack.c.bf16 %v37_v12, %v36_v11  ;;  %v205_v16 = vpack.c.bf16 %v39_v15, %v38_v14  ;;  %v40_v17 = vld [vmem:[#allocation2 + $0x50] sm:$0xff]  ;;  %v41_v18 = vld [vmem:[#allocation2 + $0x58] sm:$0xff]  ;;  %v42_v20 = vld [vmem:[#allocation2 + $0x60] sm:$0xff]  ;;  %p246_p8 = scmp.ne.s32.totalorder %s131_s30, %s245_s4  ;;  %p251_p10 = scmp.lt.s32.totalorder %s245_s4, %s245_s4 }
  0x18   :  { %195 = vmatprep.subr.bf16.mxu0 %v274_v0  ;;  %v208_v19 = vpack.c.bf16 %v41_v18, %v40_v17  ;;  %v43_v21 = vld [vmem:[#allocation2 + $0x68] sm:$0xff]  ;;  %v44_v23 = vld [vmem:[#allocation2 + $0x70] sm:$0xff]  ;;  %v45_v24 = vld [vmem:[#allocation2 + $0x78] sm:$0xff] }
  0x19   :  { %v211_v22 = vpack.c.bf16 %v43_v21, %v42_v20  ;;  %v214_v25 = vpack.c.bf16 %v45_v24, %v44_v23  ;;  %v29_v26 = vld [vmem:[%s328_s0] sm:$0xff]  ;;  %p252_p11 = por %p251_p10, %p250_p9 }
  0x1a   :  { %v139_v27 = vld [vmem:[%s330_s2] ss:$0 sm:$0xff] }
  0x1b   :  { %197 = vmatpush3.bf16.msra.mxu0 %v196_v7  ;;  %p253_p12 = pnand %p252_p11, %p246_p8 }
  0x1c   :  { %198 = vmatprep.subr.bf16.mxu0 %v274_v0 }
  0x1f   :  { %200 = vmatpush3.bf16.msra.mxu0 %v199_v10 }
  0x20   :  { %201 = vmatprep.subr.bf16.mxu0 %v274_v0 }
  0x23   :  { %203 = vmatpush3.bf16.msra.mxu0 %v202_v13 }
  0x24   :  { %204 = vmatprep.subr.bf16.mxu0 %v274_v0 }
  0x27   :  { %206 = vmatpush3.bf16.msra.mxu0 %v205_v16 }
  0x28   :  { %207 = vmatprep.subr.bf16.mxu0 %v274_v0 }
  0x2b   :  { %209 = vmatpush3.bf16.msra.mxu0 %v208_v19 }
  0x2c   :  { %210 = vmatprep.subr.bf16.mxu0 %v274_v0 }
  0x2f   :  { %212 = vmatpush3.bf16.msra.mxu0 %v211_v22 }
  0x30   :  { %213 = vmatprep.subr.bf16.mxu0 %v274_v0 }
  0x33   :  { %215 = vmatpush3.bf16.msra.mxu0 %v214_v25 }
  0x36   :  { %190 = vmatmul.mubr.f32.vlgmr.msra.gmra.mrb[0].mxu0 %v29_v26 }
 0x109   :  { %v119_v28 = vpop.f32.mrb[0].mxu0 }
 0x10a   :  { %v120_v29 = vadd.f32 %v139_v27, %v119_v28  ;;  %v191_v30 = vpop.f32.mrb[1].mxu0 }
 0x10c   :  { %123 = vst [vmem:[#allocation5] sm:$0xff] %v120_v29 }
 0x10d   :  { %256 = shalt.err (!%p253_p12)
}
 0x10e   :  { %s257_s6 = scalar_lea.hbm %s331_s3, 128 }
 0x10f   :  { %p258_p13 = scmp.ne.s32.totalorder %s331_s3, %s257_s6  ;;  %p261_p0 = scmp.lt.u32.totalorder %s257_s6, %s331_s3 }
 0x111   :  { %p263_p1 = pnand %p261_p0, %p258_p13 }
 0x113   :  { %266 = shalt.err (!%p263_p1)
}
 0x114   :  { %133 = dma.vmem_to_hbm [thread:$0]  %s131_s30, 128, %s331_s3, [#allocation4]  }
 0x115   :  { %269 = dma.done.wait [#allocation4], 128  }
 0x116   :  { %270 = vsyncadd [#allocation4], 4294967168 }
 0x117   :  { %137 = vsyncpa [#allocation3], 1 }
 0x118   :  { %138 = vsyncpa [#allocation4], 1 }

</bundles_post_ra>
